<compile_context>
chip_gen: v6e
topology: v6e:2x2x1
jax: 0.10.0
libtpu: 0.0.40
codegen_flags: <defaults>
</compile_context>

<pallas_src>
import math

import jax
import jax.numpy as jnp
from jax import lax
from jax.experimental import pallas as pl
from jax.experimental.pallas import tpu as pltpu

_MIB = 1024 * 1024


# ----------------------------------------------------------------------------
# Kernels
# ----------------------------------------------------------------------------
def _linear_kernel(x_ref, w_ref, b_ref, o_ref):
    # x: (tm, K)  w: (tn, K)  b: (1, tn)  o: (tm, tn)
    acc = lax.dot_general(
        x_ref[...], w_ref[...],
        dimension_numbers=(((1,), (1,)), ((), ())),   # contract K with K (w stays (N,K))
        preferred_element_type=jnp.float32)
    o_ref[...] = (acc + b_ref[...].astype(jnp.float32)).astype(o_ref.dtype)


def _linear_kernel_kacc(x_ref, w_ref, b_ref, o_ref, acc_ref):
    # Same as above but with a K reduction axis (grid axis 2, innermost) and an
    # f32 VMEM accumulator that stays resident across it.
    k = pl.program_id(2)

    @pl.when(k == 0)
    def _():
        acc_ref[...] = jnp.zeros_like(acc_ref)

    acc_ref[...] += lax.dot_general(
        x_ref[...], w_ref[...],
        dimension_numbers=(((1,), (1,)), ((), ())),
        preferred_element_type=jnp.float32)

    @pl.when(k == pl.num_programs(2) - 1)
    def _():
        o_ref[...] = (acc_ref[...] + b_ref[...].astype(jnp.float32)).astype(o_ref.dtype)


# ----------------------------------------------------------------------------
# Tile selection (generation / VMEM aware)
# ----------------------------------------------------------------------------
def _vmem_capacity_bytes():
    """Per-TensorCore VMEM capacity; conservative (v7x) fallback if unknown."""
    try:
        return int(pltpu.get_tpu_info().vmem_capacity_bytes)
    except Exception:
        return 64 * _MIB


def _round_up(x, m):
    return ((x + m - 1) // m) * m


def _vmem_usage_bytes(tm, tk, tn, in_itemsize, out_itemsize, use_acc):
    # Double-buffered in/out tiles + resident f32 accumulator (if K-tiled).
    x_tile = tm * tk * in_itemsize
    w_tile = tn * tk * in_itemsize
    b_tile = tn * in_itemsize
    o_tile = tm * tn * out_itemsize
    usage = 2 * (x_tile + w_tile + b_tile + o_tile)
    if use_acc:
        usage += tm * tn * 4
    return usage


def _select_tiles(R, K, N, in_itemsize, out_itemsize, vmem_budget):
    # N (lane) tile: lane-dense (multiple of 128) when tiling is worthwhile;
    # otherwise the full extent (always a legal block dim).
    if N % 128 == 0 and N > 512:
        tn = 512
        while N % tn != 0:
            tn //= 2          # terminates at 128 since N % 128 == 0
    else:
        tn = N
    # K (contraction) tile: only tile when the weight panel is large.
    if K % 128 == 0 and K > 2048:
        tk = 512 if K % 512 == 0 else (256 if K % 256 == 0 else 128)
    else:
        tk = K
    use_acc = (tk != K)

    # M (row) tile ladder: largest entries that fit the VMEM budget, capped at
    # the (8-rounded) row count so tiny inputs don't over-pad.
    row_cap = _round_up(max(R, 8), 8)
    ladder, seen = [], set()
    for cand in (1024, 512, 256, 128, 64, 32, 16, 8):
        cand = min(cand, row_cap)
        if cand in seen:
            continue
        seen.add(cand)
        if _vmem_usage_bytes(cand, tk, tn, in_itemsize, out_itemsize, use_acc) <= vmem_budget:
            ladder.append(cand)
    if not ladder:
        ladder = [8]

    # Prefer a tile that divides R exactly (no wrapper-side pad copy of x),
    # as long as it isn't so small that per-step overhead dominates.
    tm_best = ladder[0]
    tm_div = next((c for c in ladder if R % c == 0), None)
    if tm_div is not None and (tm_div >= 128 or tm_div == tm_best):
        return tm_div, tk, tn, use_acc
    return tm_best, tk, tn, use_acc


def _make_x_spec(tm, tk, index_map, triple_buffer):
    # Triple-buffer the streamed x tiles when the weight is fully resident
    # (pure HBM stream); fall back gracefully if the API isn't available.
    if triple_buffer and hasattr(pl, "Buffered"):
        try:
            return pl.BlockSpec((tm, tk), index_map, pipeline_mode=pl.Buffered(3))
        except TypeError:
            pass
    return pl.BlockSpec((tm, tk), index_map)


# ----------------------------------------------------------------------------
# Pallas linear:  y = x2d @ w.T + b   (PyTorch nn.Linear layout, no w.T copy)
# ----------------------------------------------------------------------------
def linear_pallas(x2d, w, b, compute_dtype=None):
    """x2d: (R, K), w: (N, K) (PyTorch layout), b: (N,). Returns (R, N)."""
    R, K = x2d.shape
    N = w.shape[0]
    out_dtype = x2d.dtype

    if compute_dtype is not None:           # e.g. jnp.bfloat16 on v6e/v7x
        x2d = x2d.astype(compute_dtype)
        w = w.astype(compute_dtype)
        b = b.astype(compute_dtype)

    in_itemsize = jnp.dtype(x2d.dtype).itemsize
    out_itemsize = jnp.dtype(out_dtype).itemsize

    capacity = _vmem_capacity_bytes()
    tile_budget = capacity // 3             # headroom for pipelining + compiler scratch
    tm, tk, tn, use_acc = _select_tiles(R, K, N, in_itemsize, out_itemsize, tile_budget)

    # Pad rows only when no suitable divisor tile exists (e.g. R % 8 != 0),
    # so the common case streams x straight from HBM with no extra copy.
    R_pad = _round_up(R, tm)
    if R_pad != R:
        x2d = jnp.pad(x2d, ((0, R_pad - R), (0, 0)))

    b2 = b.reshape(1, N)

    grid_m = R_pad // tm
    grid_n = N // tn
    grid_k = K // tk

    usage = _vmem_usage_bytes(tm, tk, tn, in_itemsize, out_itemsize, use_acc)
    vmem_limit = int(min(capacity * 4 // 5, max(usage + 8 * _MIB, 32 * _MIB)))

    cost = pl.CostEstimate(
        flops=2 * R_pad * K * N,
        transcendentals=0,
        bytes_accessed=(R_pad * K * in_itemsize + N * K * in_itemsize
                        + N * in_itemsize + R_pad * N * out_itemsize))

    stream_x = (grid_k == 1 and grid_m >= 4)

    if not use_acc:
        out = pl.pallas_call(
            _linear_kernel,
            out_shape=jax.ShapeDtypeStruct((R_pad, N), out_dtype),
            grid_spec=pltpu.PrefetchScalarGridSpec(
                num_scalar_prefetch=0,
                grid=(grid_m, grid_n),
                in_specs=[
                    _make_x_spec(tm, tk, lambda i, j: (i, 0), stream_x),  # row tile of x
                    pl.BlockSpec((tn, tk), lambda i, j: (j, 0)),          # (N,K) weight tile
                    pl.BlockSpec((1, tn), lambda i, j: (0, j)),           # bias slice
                ],
                out_specs=pl.BlockSpec((tm, tn), lambda i, j: (i, j)),
            ),
            compiler_params=pltpu.CompilerParams(
                dimension_semantics=("parallel", "parallel"),
                vmem_limit_bytes=vmem_limit),
            cost_estimate=cost,
        )(x2d, w, b2)
    else:
        out = pl.pallas_call(
            _linear_kernel_kacc,
            out_shape=jax.ShapeDtypeStruct((R_pad, N), out_dtype),
            grid_spec=pltpu.PrefetchScalarGridSpec(
                num_scalar_prefetch=0,
                grid=(grid_m, grid_n, grid_k),
                in_specs=[
                    pl.BlockSpec((tm, tk), lambda i, j, k: (i, k)),
                    pl.BlockSpec((tn, tk), lambda i, j, k: (j, k)),
                    pl.BlockSpec((1, tn), lambda i, j, k: (0, j)),
                ],
                out_specs=pl.BlockSpec((tm, tn), lambda i, j, k: (i, j)),
                scratch_shapes=[pltpu.VMEM((tm, tn), jnp.float32)],
            ),
            compiler_params=pltpu.CompilerParams(
                dimension_semantics=("parallel", "parallel", "arbitrary"),
                vmem_limit_bytes=vmem_limit),
            cost_estimate=cost,
        )(x2d, w, b2)

    if R_pad != R:
        out = out[:R]
    return out


# ----------------------------------------------------------------------------
# TimeDistributed.forward
# ----------------------------------------------------------------------------
def time_distributed_linear(x, w, b, batch_first=False, compute_dtype=None):
    """Mirror of TimeDistributed(nn.Linear(...), batch_first).forward(x)."""
    if x.ndim <= 2:
        if x.ndim == 1:
            return linear_pallas(x[None, :], w, b, compute_dtype)[0]
        return linear_pallas(x, w, b, compute_dtype)
    x2 = x.reshape(-1, x.shape[-1])                 # x.contiguous().view(-1, x.size(-1))
    y2 = linear_pallas(x2, w, b, compute_dtype)
    if batch_first:
        return y2.reshape(x.shape[0], -1, y2.shape[-1])
    return y2.reshape(-1, x.shape[1], y2.shape[-1])


def init_linear_params(key, in_features, out_features, dtype=jnp.float32):
    # Deterministic init mimicking torch.nn.Linear: U(-1/sqrt(fan_in), 1/sqrt(fan_in))
    kw, kb = jax.random.split(key)
    bound = 1.0 / math.sqrt(in_features)
    w = jax.random.uniform(kw, (out_features, in_features), dtype,
                           minval=-bound, maxval=bound)
    b = jax.random.uniform(kb, (out_features,), dtype,
                           minval=-bound, maxval=bound)
    return w, b


if __name__ == "__main__":
    key = jax.random.PRNGKey(0)
    kx, kp, kx2 = jax.random.split(key, 3)

    seq, batch, in_features, out_features = 8, 2, 32, 32
    x = jax.random.normal(kx, (seq, batch, in_features), dtype=jnp.float32)
    w, b = init_linear_params(kp, in_features, out_features)

    # batch_first=False (module default)
    y = jax.block_until_ready(time_distributed_linear(x, w, b, batch_first=False))
    y_ref = (x.reshape(-1, in_features) @ w.T + b).reshape(-1, batch, out_features)
    assert y.shape == (seq, batch, out_features), y.shape
    assert jnp.allclose(y, y_ref, atol=1e-5, rtol=1e-5)

    # batch_first=True branch
    yb = jax.block_until_ready(time_distributed_linear(x, w, b, batch_first=True))
    yb_ref = (x.reshape(-1, in_features) @ w.T + b).reshape(seq, -1, out_features)
    assert jnp.allclose(yb, yb_ref, atol=1e-5, rtol=1e-5)

    # <=2-D branch of TimeDistributed.forward
    x2d = x[0]                                      # (batch, in_features)
    y2d = jax.block_until_ready(time_distributed_linear(x2d, w, b))
    assert y2d.shape == (batch, out_features)
    assert jnp.allclose(y2d, x2d @ w.T + b, atol=1e-5, rtol=1e-5)

    # Ragged row count (exercises the pad-and-slice fallback path)
    xr = jax.random.normal(kx2, (5, 3, in_features), dtype=jnp.float32)
    yr = jax.block_until_ready(time_distributed_linear(xr, w, b))
    yr_ref = (xr.reshape(-1, in_features) @ w.T + b).reshape(-1, 3, out_features)
    assert jnp.allclose(yr, yr_ref, atol=1e-5, rtol=1e-5)

    print("KERNEL_OK")
</pallas_src>

<mosaic_0001>
module attributes {stable_mosaic.version = 11 : i64} {
  func.func @_linear_kernel(%arg0: i32, %arg1: i32, %arg2: memref<16x32xf32, #tpu.memory_space<vmem>>, %arg3: memref<32x32xf32, #tpu.memory_space<vmem>>, %arg4: memref<1x32xf32, #tpu.memory_space<vmem>>, %arg5: memref<16x32xf32, #tpu.memory_space<vmem>>) attributes {dimension_semantics = [#tpu.dimension_semantics<parallel>, #tpu.dimension_semantics<parallel>], iteration_bounds = array<i64: 1, 1>, scalar_prefetch = 0 : i64, scratch_operands = 0 : i64, tpu.core_type = #tpu.core_type<tc>, window_params = [{transform_indices = @transform_0, window_bounds = array<i64: 16, 32>}, {transform_indices = @transform_1, window_bounds = array<i64: 32, 32>}, {transform_indices = @transform_2, window_bounds = array<i64: 1, 32>}, {transform_indices = @transform_3, window_bounds = array<i64: 16, 32>}]} {
    %c0 = arith.constant 0 : index
    %c0_0 = arith.constant 0 : index
    %0 = vector.load %arg2[%c0, %c0_0] : memref<16x32xf32, #tpu.memory_space<vmem>>, vector<16x32xf32>
    %c0_1 = arith.constant 0 : index
    %c0_2 = arith.constant 0 : index
    %1 = vector.load %arg3[%c0_1, %c0_2] : memref<32x32xf32, #tpu.memory_space<vmem>>, vector<32x32xf32>
    %cst = arith.constant dense<0.000000e+00> : vector<16x32xf32>
    %2 = tpu.matmul %0, %1, %cst {dimension_numbers = #tpu.dot_dimension_numbers<[1], [1], [0], [0], [0, 0, 1, 0], [], []>} : vector<16x32xf32>, vector<32x32xf32>, vector<16x32xf32> -> vector<16x32xf32>
    %c0_3 = arith.constant 0 : index
    %c0_4 = arith.constant 0 : index
    %3 = vector.load %arg4[%c0_3, %c0_4] : memref<1x32xf32, #tpu.memory_space<vmem>>, vector<1x32xf32>
    %4 = vector.broadcast %3 : vector<1x32xf32> to vector<16x32xf32>
    %5 = arith.addf %2, %4 : vector<16x32xf32>
    %c0_5 = arith.constant 0 : index
    %c0_6 = arith.constant 0 : index
    %6 = vector.load %arg5[%c0_5, %c0_6] : memref<16x32xf32, #tpu.memory_space<vmem>>, vector<16x32xf32>
    tpu.vector_store %arg5[%c0_5, %c0_6], %5 {strides = array<i32>} : memref<16x32xf32, #tpu.memory_space<vmem>>, vector<16x32xf32>,
    return
  }
  func.func @transform_0(%arg0: i32, %arg1: i32) -> (i32, i32) {
    %c0_i32 = arith.constant 0 : i32
    %c0_i32_0 = arith.constant 0 : i32
    return %arg0, %c0_i32 : i32, i32
  }
  func.func @transform_1(%arg0: i32, %arg1: i32) -> (i32, i32) {
    %c0_i32 = arith.constant 0 : i32
    %c0_i32_0 = arith.constant 0 : i32
    return %arg1, %c0_i32 : i32, i32
  }
  func.func @transform_2(%arg0: i32, %arg1: i32) -> (i32, i32) {
    %c0_i32 = arith.constant 0 : i32
    %c0_i32_0 = arith.constant 0 : i32
    return %c0_i32, %arg1 : i32, i32
  }
  func.func @transform_3(%arg0: i32, %arg1: i32) -> (i32, i32) {
    %c0_i32 = arith.constant 0 : i32
    return %arg0, %arg1 : i32, i32
  }
}

</mosaic_0001>

<bundles_post_ra>
// kernel: tpu_custom_call.1
= control target key start
LH: loop header
LB: loop body
LE: loop exit
PB: predicated region body
PF: predicated region fallthrough
CT: control target
= control target key end

     0   :  { %8 = vsyncpa [#allocation3], 0  ;;  %s323_s0 = inlined_call_operand.hbm [shape: f32[16,32], index: 0, kind: input, shape index: {}]   ;;  %s324_s1 = inlined_call_operand.hbm [shape: f32[32,32], index: 1, kind: input, shape index: {}]   ;;  %s325_s2 = inlined_call_operand.vmem [shape: f32[1,32], index: 2, kind: input, shape index: {}]   ;;  %s326_s3 = inlined_call_operand.hbm [shape: f32[16,32], index: 3, kind: output, shape index: {}]  }
   0x1   :  { %9 = vsyncpa [#allocation6], 0 }
   0x2   :  { %10 = vsyncpa [#allocation4], 0  ;;  %s265_s12 = smov [#allocation2]  }
   0x3   :  { %s16_s13 = sshll.u32 %s265_s12, 4  ;;  %s17_s13 = int_to_ptr.vmem [resolvable:$true] %s16_s13 }
   0x4   :  { %s207_s14 = scalar_lea.vmem %s17_s13, 256  ;;  %p212_p1 = scmp.lt.s32.totalorder %s17_s13, %s17_s13 }
   0x5   :  { %p208_p0 = scmp.ne.s32.totalorder %s17_s13, %s207_s14  ;;  %p213_p2 = scmp.lt.s32.totalorder %s207_s14, %s207_s14 }
   0x7   :  { %p214_p3 = por %p213_p2, %p212_p1 }
   0x9   :  { %p215_p4 = pnand %p214_p3, %p208_p0 }
   0xb   :  { %218 = shalt.err (!%p215_p4)
}
   0xc   :  { %s266_s15 = smov 128   ;;  %s267_s16 = smov 8  }
   0xd   :  { %22 = dma.hbm_to_vmem [thread:$0]  %s323_s0, 256, %s17_s13, [#allocation3], %s266_s15, %s266_s15, %s267_s16  }
   0xe   :  { %s268_s19 = smov [#allocation5]  }
   0xf   :  { %s28_s20 = sshll.u32 %s268_s19, 4  ;;  %s29_s20 = int_to_ptr.vmem [resolvable:$true] %s28_s20 }
  0x10   :  { %s227_s21 = scalar_lea.vmem %s29_s20, 512  ;;  %p232_p6 = scmp.lt.s32.totalorder %s29_s20, %s29_s20 }
  0x11   :  { %p228_p5 = scmp.ne.s32.totalorder %s29_s20, %s227_s21  ;;  %p233_p7 = scmp.lt.s32.totalorder %s227_s21, %s227_s21 }
  0x13   :  { %p234_p8 = por %p233_p7, %p232_p6 }
  0x15   :  { %p235_p9 = pnand %p234_p8, %p228_p5 }
  0x17   :  { %238 = shalt.err (!%p235_p9)
}
  0x18   :  { %34 = dma.hbm_to_vmem [thread:$0]  %s324_s1, 512, %s29_s20, [#allocation6], %s266_s15, %s266_s15, %s267_s16  }
  0x19   :  { %259 = dma.done.wait [#allocation3], 256  }
  0x1a   :  { %260 = vsyncadd [#allocation3], 4294967040 }
  0x1b   :  { %261 = dma.done.wait [#allocation6], 512  }
  0x1c   :  { %262 = vsyncadd [#allocation6], 4294966784  ;;  %vm56_vm0 = vcmask 261120   ;;  %v48_v0 = vld [vmem:[#allocation5 + $0x18] sm:$0xff]  ;;  %v47_v1 = vld [vmem:[#allocation5 + $0x10] sm:$0xff]  ;;  %s269_s24 = smov [#allocation7]  }
  0x1d   :  { %183 = vmatprep.subr.msk.mxu0 %vm56_vm0, %v48_v0  ;;  %v43_v2 = vld [vmem:[#allocation2] sm:$0xff]  ;;  %v46_v3 = vld [vmem:[#allocation5 + $0x8] sm:$0xff]  ;;  %v45_v4 = vld [vmem:[#allocation5] sm:$0xff]  ;;  %s157_s25 = sshll.u32 %s269_s24, 4  ;;  %s158_s25 = int_to_ptr.vmem [resolvable:$true] %s157_s25 }
  0x1e   :  { %184 = vmatpush3.xpose.msk.msra.mxu0 %vm56_vm0, %v48_v0  ;;  %191 = vmatprep.mubr.msk.f32.mxu0 %vm56_vm0, %v43_v2  ;;  %v44_v5 = vld [vmem:[#allocation2 + $0x8] sm:$0xff]  ;;  %v170_v6 = vld [vmem:[%s325_s2] ss:$0 sm:$0xff]  ;;  %s239_s26 = scalar_lea.vmem %s158_s25, 256  ;;  %p244_p11 = scmp.lt.s32.totalorder %s158_s25, %s158_s25 }
  0x1f   :  { %185 = vmatprep.subr.msk.mxu0 %vm56_vm0, %v47_v1  ;;  %p240_p10 = scmp.ne.s32.totalorder %s158_s25, %s239_s26  ;;  %p245_p12 = scmp.lt.s32.totalorder %s239_s26, %s239_s26 }
  0x21   :  { %p246_p13 = por %p245_p12, %p244_p11 }
  0x22   :  { %186 = vmatpush3.xpose.msk.msra.mxu0 %vm56_vm0, %v47_v1 }
  0x23   :  { %187 = vmatprep.subr.msk.mxu0 %vm56_vm0, %v46_v3  ;;  %p247_p0 = pnand %p246_p13, %p240_p10 }
  0x26   :  { %188 = vmatpush3.xpose.msk.msra.mxu0 %vm56_vm0, %v46_v3 }
  0x27   :  { %189 = vmatprep.subr.msk.mxu0 %vm56_vm0, %v45_v4 }
  0x2a   :  { %190 = vmatpush3.xpose.msk.msra.mxu0 %vm56_vm0, %v45_v4 }
  0x2d   :  { %192 = vmatmul.mubr.msk.f32.vlgmr.msra.gmra.mxu0 %vm56_vm0, %v44_v5 }
  0xed   :  { %v193_v7 = vpop.f32.mrf.mxu0 }
  0xee   :  { %v147_v8 = vadd.f32 %v193_v7, %v170_v6 }
  0xef   :  { %v141_v9 = vpop.f32.mrf.mxu0 }
  0xf0   :  { %151 = vst.msk [vmem:[#allocation7 + $0x8] sm:$0xff] %vm56_vm0, %v147_v8  ;;  %v142_v10 = vadd.f32 %v170_v6, %v141_v9 }
  0xf2   :  { %150 = vst.msk [vmem:[#allocation7] sm:$0xff] %vm56_vm0, %v142_v10 }
  0xf3   :  { %250 = shalt.err (!%p247_p0)
}
  0xf4   :  { %163 = dma.vmem_to_hbm [thread:$0]  %s158_s25, 256, %s326_s3, [#allocation4], %s266_s15, %s266_s15, %s267_s16  }
  0xf5   :  { %263 = dma.done.wait [#allocation4], 256  }
  0xf6   :  { %264 = vsyncadd [#allocation4], 4294967040 }
  0xf7   :  { %167 = vsyncpa [#allocation3], 1 }
  0xf8   :  { %168 = vsyncpa [#allocation6], 1 }
  0xf9   :  { %169 = vsyncpa [#allocation4], 1 }

</bundles_post_ra>
